<compile_context>
chip_gen: v6e
topology: v6e:2x2x1
jax: 0.10.0
libtpu: 0.0.40
codegen_flags: <defaults>
</compile_context>

<pallas_src>
import functools

import jax
import jax.numpy as jnp
from jax.experimental import pallas as pl
from jax.experimental.pallas import tpu as pltpu


_MIB = 1024 * 1024


def _cdiv(a, b):
    return (a + b - 1) // b


def _tpu_vmem_capacity_bytes():
    """Physical VMEM per TensorCore; falls back to the smallest (v7x) value."""
    try:
        return int(pltpu.get_tpu_info().vmem_capacity_bytes)
    except Exception:
        return 64 * _MIB


def _choose_seq_tile(batch, seq, vmem_cap):
    if seq <= 256:
        return seq
    tile = 512
    # v7x: 2 TCs but only 64 MiB VMEM each -> drop to 256 when the grid would
    # otherwise be too short to shard across both cores AND keep >=2 pipeline
    # stages per core.  On v5e/v6e (128 MiB) keep the bigger tile.
    if vmem_cap < 96 * _MIB and batch * _cdiv(seq, tile) < 8:
        tile = 256
    return seq if seq <= tile else tile


def _choose_k_tile(d_model):
    # Only split the reduction axis when the weights are large.  K tiles must
    # exactly divide d_model (a partial reduction block would add garbage into
    # the accumulator) and stay 256-multiples to fill the 2x256^2 MXU.
    if d_model <= 1024:
        return d_model
    for tk in (512, 256, 128):
        if d_model % tk == 0:
            return tk
    return d_model


def _mha_proj_kernel(q_ref, k_ref, v_ref,
                     wq_ref, wk_ref, wv_ref,
                     bq_ref, bk_ref, bv_ref,
                     qo_ref, ko_ref, vo_ref,
                     qacc_ref, kacc_ref, vacc_ref,
                     *, n_heads, d_k, d_v, head_split, compute_dtype):
    """Three fused linear projections with a K-reduction grid axis.

    x_ref  : (1, ts, tk)        activation tile (input dtype)
    w_ref  : (tk, H*d)          pre-transposed weight panel (compute_dtype)
    b_ref  : (1, H*d)  float32  bias
    o_ref  : (1, H, ts, d) if head_split else (1, ts, H*d)
    acc_ref: (ts, H*d) float32  VMEM accumulator (persistent across K steps)
    """
    ki = pl.program_id(2)
    nk = pl.num_programs(2)

    @pl.when(ki == 0)
    def _init():
        qacc_ref[...] = jnp.zeros_like(qacc_ref)
        kacc_ref[...] = jnp.zeros_like(kacc_ref)
        vacc_ref[...] = jnp.zeros_like(vacc_ref)

    def accum(x_ref, w_ref, acc_ref):
        # bf16 operands -> fast MXU path; f32 accumulation.
        x = x_ref[0].astype(compute_dtype)
        acc_ref[...] += jnp.dot(x, w_ref[...],
                                preferred_element_type=jnp.float32)

    accum(q_ref, wq_ref, qacc_ref)
    accum(k_ref, wk_ref, kacc_ref)
    accum(v_ref, wv_ref, vacc_ref)

    @pl.when(ki == nk - 1)
    def _finalize():
        def store(acc_ref, b_ref, o_ref, d):
            y = acc_ref[...] + b_ref[...]          # f32 bias add
            if head_split:
                # d is a multiple of 128 -> each per-head store is lane-dense.
                for h in range(n_heads):
                    o_ref[0, h] = y[:, h * d:(h + 1) * d].astype(o_ref.dtype)
            else:
                # Single lane-dense (ts, H*d) store; head split done outside.
                o_ref[0] = y.astype(o_ref.dtype)

        store(qacc_ref, bq_ref, qo_ref, d_k)
        store(kacc_ref, bk_ref, ko_ref, d_k)
        store(vacc_ref, bv_ref, vo_ref, d_v)


def prepare_params(params, *, compute_dtype=jnp.bfloat16):
    """One-time parameter preparation (call at init, NOT per forward).

    Accepts PyTorch Linear layout: weights (d_out, d_model), biases (d_out,).
    Returns weights pre-transposed to (d_model, d_out) in the MXU compute
    dtype and biases as (1, d_out) float32, so the forward path pays no
    wrapper-side transpose/cast HBM pass.
    """
    def w(name):
        return jnp.asarray(params[name]).T.astype(compute_dtype)

    def b(name):
        arr = jnp.asarray(params[name])
        return arr.reshape(1, arr.shape[-1]).astype(jnp.float32)

    return {"w_q": w("w_q"), "w_k": w("w_k"), "w_v": w("w_v"),
            "b_q": b("b_q"), "b_k": b("b_k"), "b_v": b("b_v")}


def multi_head_attention_proj(q, k, v, prepared, *, d_k, d_v, n_heads,
                              compute_dtype=jnp.bfloat16, out_dtype=None,
                              split_heads_output=True, seq_tile=None):
    """Pallas implementation of _MultiHeadAttention.forward.

    q, k, v : (B, S, d_model)
    prepared: output of prepare_params() (pre-transposed / pre-cast weights).
    Returns (q_s, k_s, v_s) with shapes (B, H, S, d_k), (B, H, S, d_k),
    (B, H, S, d_v) — same as the PyTorch module.  With
    split_heads_output=False the lane-dense (B, S, H*d) arrays are returned
    instead (preferred when the downstream consumer can split heads in its own
    BlockSpec index_map).

    Note: compute_dtype=bfloat16 (default) downcasts operands vs. the f32
    PyTorch matmul; pass compute_dtype=jnp.float32 (and matching prepared
    params) for f32-exact parity.
    """
    B, S, d_model = q.shape
    d_qk = d_k * n_heads
    d_vo = d_v * n_heads
    # Default output dtype = compute dtype (bf16): the kernel is HBM-bound at
    # typical sizes, so halving writeback bytes is a direct wall-clock win.
    out_dtype = compute_dtype if out_dtype is None else out_dtype

    vmem_cap = _tpu_vmem_capacity_bytes()
    ts = seq_tile if seq_tile is not None else _choose_seq_tile(B, S, vmem_cap)
    if ts < S:
        assert ts % 8 == 0, "sequence tile must be a multiple of 8"
    tk = _choose_k_tile(d_model)
    n_s = _cdiv(S, ts)          # ragged last tile: Pallas edge-block masking
    n_k = d_model // tk

    # Fold the head-split transpose into the store only when every per-head
    # store is lane-dense (d multiple of 128); otherwise store (B, S, H*d).
    head_split = (d_k % 128 == 0) and (d_v % 128 == 0)

    # Grid-invariant blocks are single-buffered to reclaim VMEM (v7x: 64 MiB).
    w_kwargs = dict(pipeline_mode=pl.Buffered(1)) if n_k == 1 else {}
    b_kwargs = dict(pipeline_mode=pl.Buffered(1))

    act_spec = pl.BlockSpec((1, ts, tk), lambda b_, s_, k_: (b_, s_, k_))

    def w_spec(dout):
        return pl.BlockSpec((tk, dout), lambda b_, s_, k_: (k_, 0), **w_kwargs)

    def b_spec(dout):
        return pl.BlockSpec((1, dout), lambda b_, s_, k_: (0, 0), **b_kwargs)

    if head_split:
        def out_spec(d):
            return pl.BlockSpec((1, n_heads, ts, d),
                                lambda b_, s_, k_: (b_, 0, s_, 0))
        out_shapes = (
            jax.ShapeDtypeStruct((B, n_heads, S, d_k), out_dtype),
            jax.ShapeDtypeStruct((B, n_heads, S, d_k), out_dtype),
            jax.ShapeDtypeStruct((B, n_heads, S, d_v), out_dtype),
        )
        out_specs = [out_spec(d_k), out_spec(d_k), out_spec(d_v)]
    else:
        def out_spec(dout):
            return pl.BlockSpec((1, ts, dout), lambda b_, s_, k_: (b_, s_, 0))
        out_shapes = (
            jax.ShapeDtypeStruct((B, S, d_qk), out_dtype),
            jax.ShapeDtypeStruct((B, S, d_qk), out_dtype),
            jax.ShapeDtypeStruct((B, S, d_vo), out_dtype),
        )
        out_specs = [out_spec(d_qk), out_spec(d_qk), out_spec(d_vo)]

    vmem_limit = 100 * _MIB if vmem_cap >= 96 * _MIB else 48 * _MIB

    kernel = functools.partial(
        _mha_proj_kernel, n_heads=n_heads, d_k=d_k, d_v=d_v,
        head_split=head_split, compute_dtype=compute_dtype)

    q_o, k_o, v_o = pl.pallas_call(
        kernel,
        out_shape=out_shapes,
        grid_spec=pltpu.PrefetchScalarGridSpec(
            num_scalar_prefetch=0,
            grid=(B, n_s, n_k),
            in_specs=[
                act_spec, act_spec, act_spec,
                w_spec(d_qk), w_spec(d_qk), w_spec(d_vo),
                b_spec(d_qk), b_spec(d_qk), b_spec(d_vo),
            ],
            out_specs=out_specs,
            scratch_shapes=[
                pltpu.VMEM((ts, d_qk), jnp.float32),
                pltpu.VMEM((ts, d_qk), jnp.float32),
                pltpu.VMEM((ts, d_vo), jnp.float32),
            ]),
        compiler_params=pltpu.CompilerParams(
            dimension_semantics=("parallel", "parallel", "arbitrary"),
            vmem_limit_bytes=vmem_limit),
    )(q, k, v,
      prepared["w_q"], prepared["w_k"], prepared["w_v"],
      prepared["b_q"], prepared["b_k"], prepared["b_v"])

    if head_split or not split_heads_output:
        return q_o, k_o, v_o

    # Lane-dense kernel output -> module contract (B, H, S, d).  Prefer
    # split_heads_output=False downstream to skip this XLA transpose pass.
    def split(y, d):
        return y.reshape(B, S, n_heads, d).transpose(0, 2, 1, 3)

    return split(q_o, d_k), split(k_o, d_k), split(v_o, d_v)


def _init_params(key, d_model, d_k, d_v, n_heads):
    """Deterministic synthetic parameters (PyTorch Linear (out, in) layout)."""
    ks = jax.random.split(key, 6)
    d_qk = d_k * n_heads
    d_vo = d_v * n_heads
    scale = 1.0 / jnp.sqrt(d_model)
    return {
        "w_q": jax.random.normal(ks[0], (d_qk, d_model), jnp.float32) * scale,
        "w_k": jax.random.normal(ks[1], (d_qk, d_model), jnp.float32) * scale,
        "w_v": jax.random.normal(ks[2], (d_vo, d_model), jnp.float32) * scale,
        "b_q": jax.random.normal(ks[3], (d_qk,), jnp.float32) * 0.01,
        "b_k": jax.random.normal(ks[4], (d_qk,), jnp.float32) * 0.01,
        "b_v": jax.random.normal(ks[5], (d_vo,), jnp.float32) * 0.01,
    }


def _run_case(key, B, S, d_model, d_k, d_v, n_heads, seq_tile=None):
    kq, kk, kv, kp = jax.random.split(key, 4)
    q = jax.random.normal(kq, (B, S, d_model), jnp.float32)
    k = jax.random.normal(kk, (B, S, d_model), jnp.float32)
    v = jax.random.normal(kv, (B, S, d_model), jnp.float32)
    raw = _init_params(kp, d_model, d_k, d_v, n_heads)
    prepared = prepare_params(raw)                     # one-time, at init

    q_s, k_s, v_s = multi_head_attention_proj(
        q, k, v, prepared, d_k=d_k, d_v=d_v, n_heads=n_heads,
        seq_tile=seq_tile)
    jax.block_until_ready((q_s, k_s, v_s))

    # Reference in plain JAX: same math (bf16 operands, f32 acc, f32 bias).
    def ref_proj(x, w, b, d):
        y = jnp.dot(x.reshape(B * S, d_model).astype(jnp.bfloat16),
                    w.T.astype(jnp.bfloat16),
                    preferred_element_type=jnp.float32) + b.reshape(1, -1)
        return y.reshape(B, S, n_heads, d).transpose(0, 2, 1, 3)

    refs = (ref_proj(q, raw["w_q"], raw["b_q"], d_k),
            ref_proj(k, raw["w_k"], raw["b_k"], d_k),
            ref_proj(v, raw["w_v"], raw["b_v"], d_v))
    for out, ref, d in zip((q_s, k_s, v_s), refs, (d_k, d_k, d_v)):
        assert out.shape == (B, n_heads, S, d), (out.shape, (B, n_heads, S, d))
        err = float(jnp.max(jnp.abs(out.astype(jnp.float32) - ref)))
        assert err < 3e-2, err


if __name__ == "__main__":
    key = jax.random.PRNGKey(0)
    k1, k2 = jax.random.split(key)
    # Small shapes consistent with the module's forward.
    _run_case(k1, B=2, S=8, d_model=32, d_k=8, d_v=8, n_heads=4)
    # Ragged sequence tiling (S not a multiple of the tile): exercises the
    # no-pad / edge-block-masking path.
    _run_case(k2, B=2, S=24, d_model=32, d_k=8, d_v=8, n_heads=4, seq_tile=16)
    print("KERNEL_OK")
</pallas_src>

<mosaic_0001>
module attributes {stable_mosaic.version = 11 : i64} {
  func.func @_mha_proj_kernel(%arg0: i32, %arg1: i32, %arg2: i32, %arg3: memref<1x8x32xf32, #tpu.memory_space<vmem>>, %arg4: memref<1x8x32xf32, #tpu.memory_space<vmem>>, %arg5: memref<1x8x32xf32, #tpu.memory_space<vmem>>, %arg6: memref<32x32xbf16, #tpu.memory_space<vmem>>, %arg7: memref<32x32xbf16, #tpu.memory_space<vmem>>, %arg8: memref<32x32xbf16, #tpu.memory_space<vmem>>, %arg9: memref<1x32xf32, #tpu.memory_space<vmem>>, %arg10: memref<1x32xf32, #tpu.memory_space<vmem>>, %arg11: memref<1x32xf32, #tpu.memory_space<vmem>>, %arg12: memref<1x8x32xbf16, #tpu.memory_space<vmem>>, %arg13: memref<1x8x32xbf16, #tpu.memory_space<vmem>>, %arg14: memref<1x8x32xbf16, #tpu.memory_space<vmem>>, %arg15: memref<8x32xf32, #tpu.memory_space<vmem>>, %arg16: memref<8x32xf32, #tpu.memory_space<vmem>>, %arg17: memref<8x32xf32, #tpu.memory_space<vmem>>) attributes {dimension_semantics = [#tpu.dimension_semantics<parallel>, #tpu.dimension_semantics<parallel>, #tpu.dimension_semantics<arbitrary>], iteration_bounds = array<i64: 2, 1, 1>, scalar_prefetch = 0 : i64, scratch_operands = 3 : i64, tpu.core_type = #tpu.core_type<tc>, window_params = [{transform_indices = @transform_0, window_bounds = array<i64: 1, 8, 32>}, {transform_indices = @transform_1, window_bounds = array<i64: 1, 8, 32>}, {transform_indices = @transform_2, window_bounds = array<i64: 1, 8, 32>}, {pipeline_mode = #tpu.pipeline_mode<synchronous>, transform_indices = @transform_3, window_bounds = array<i64: 32, 32>}, {pipeline_mode = #tpu.pipeline_mode<synchronous>, transform_indices = @transform_4, window_bounds = array<i64: 32, 32>}, {pipeline_mode = #tpu.pipeline_mode<synchronous>, transform_indices = @transform_5, window_bounds = array<i64: 32, 32>}, {pipeline_mode = #tpu.pipeline_mode<synchronous>, transform_indices = @transform_6, window_bounds = array<i64: 1, 32>}, {pipeline_mode = #tpu.pipeline_mode<synchronous>, transform_indices = @transform_7, window_bounds = array<i64: 1, 32>}, {pipeline_mode = #tpu.pipeline_mode<synchronous>, transform_indices = @transform_8, window_bounds = array<i64: 1, 32>}, {transform_indices = @transform_9, window_bounds = array<i64: 1, 8, 32>}, {transform_indices = @transform_10, window_bounds = array<i64: 1, 8, 32>}, {transform_indices = @transform_11, window_bounds = array<i64: 1, 8, 32>}]} {
    %c0_i32 = arith.constant 0 : i32
    %0 = arith.cmpi eq, %arg2, %c0_i32 : i32
    %1 = arith.extui %0 : i1 to i32
    %c0_i32_0 = arith.constant 0 : i32
    %2 = arith.cmpi ne, %1, %c0_i32_0 : i32
    scf.if %2 {
      %cst_31 = arith.constant 0.000000e+00 : f32
      %30 = vector.broadcast %cst_31 : f32 to vector<8x32xf32>
      %c0_32 = arith.constant 0 : index
      %c0_33 = arith.constant 0 : index
      %31 = vector.load %arg15[%c0_32, %c0_33] : memref<8x32xf32, #tpu.memory_space<vmem>>, vector<8x32xf32>
      tpu.vector_store %arg15[%c0_32, %c0_33], %30 {strides = array<i32>} : memref<8x32xf32, #tpu.memory_space<vmem>>, vector<8x32xf32>,
      %cst_34 = arith.constant 0.000000e+00 : f32
      %32 = vector.broadcast %cst_34 : f32 to vector<8x32xf32>
      %c0_35 = arith.constant 0 : index
      %c0_36 = arith.constant 0 : index
      %33 = vector.load %arg16[%c0_35, %c0_36] : memref<8x32xf32, #tpu.memory_space<vmem>>, vector<8x32xf32>
      tpu.vector_store %arg16[%c0_35, %c0_36], %32 {strides = array<i32>} : memref<8x32xf32, #tpu.memory_space<vmem>>, vector<8x32xf32>,
      %cst_37 = arith.constant 0.000000e+00 : f32
      %34 = vector.broadcast %cst_37 : f32 to vector<8x32xf32>
      %c0_38 = arith.constant 0 : index
      %c0_39 = arith.constant 0 : index
      %35 = vector.load %arg17[%c0_38, %c0_39] : memref<8x32xf32, #tpu.memory_space<vmem>>, vector<8x32xf32>
      tpu.vector_store %arg17[%c0_38, %c0_39], %34 {strides = array<i32>} : memref<8x32xf32, #tpu.memory_space<vmem>>, vector<8x32xf32>,
    } else {
    }
    %c0 = arith.constant 0 : index
    %c0_1 = arith.constant 0 : index
    %c0_2 = arith.constant 0 : index
    %3 = vector.load %arg3[%c0, %c0_1, %c0_2] : memref<1x8x32xf32, #tpu.memory_space<vmem>>, vector<1x8x32xf32>
    %4 = vector.shape_cast %3 : vector<1x8x32xf32> to vector<8x32xf32>
    %5 = arith.truncf %4 : vector<8x32xf32> to vector<8x32xbf16>
    %c0_3 = arith.constant 0 : index
    %c0_4 = arith.constant 0 : index
    %6 = vector.load %arg15[%c0_3, %c0_4] : memref<8x32xf32, #tpu.memory_space<vmem>>, vector<8x32xf32>
    %c0_5 = arith.constant 0 : index
    %c0_6 = arith.constant 0 : index
    %7 = vector.load %arg6[%c0_5, %c0_6] : memref<32x32xbf16, #tpu.memory_space<vmem>>, vector<32x32xbf16>
    %cst = arith.constant dense<0.000000e+00> : vector<8x32xf32>
    %8 = tpu.matmul %5, %7, %cst {dimension_numbers = #tpu.dot_dimension_numbers<[1], [0], [0], [1], [0, 0, 1, 1], [], []>} : vector<8x32xbf16>, vector<32x32xbf16>, vector<8x32xf32> -> vector<8x32xf32>
    %9 = arith.addf %6, %8 : vector<8x32xf32>
    %c0_7 = arith.constant 0 : index
    %c0_8 = arith.constant 0 : index
    %10 = vector.load %arg15[%c0_7, %c0_8] : memref<8x32xf32, #tpu.memory_space<vmem>>, vector<8x32xf32>
    tpu.vector_store %arg15[%c0_7, %c0_8], %9 {strides = array<i32>} : memref<8x32xf32, #tpu.memory_space<vmem>>, vector<8x32xf32>,
    %c0_9 = arith.constant 0 : index
    %c0_10 = arith.constant 0 : index
    %c0_11 = arith.constant 0 : index
    %11 = vector.load %arg4[%c0_9, %c0_10, %c0_11] : memref<1x8x32xf32, #tpu.memory_space<vmem>>, vector<1x8x32xf32>
    %12 = vector.shape_cast %11 : vector<1x8x32xf32> to vector<8x32xf32>
    %13 = arith.truncf %12 : vector<8x32xf32> to vector<8x32xbf16>
    %c0_12 = arith.constant 0 : index
    %c0_13 = arith.constant 0 : index
    %14 = vector.load %arg16[%c0_12, %c0_13] : memref<8x32xf32, #tpu.memory_space<vmem>>, vector<8x32xf32>
    %c0_14 = arith.constant 0 : index
    %c0_15 = arith.constant 0 : index
    %15 = vector.load %arg7[%c0_14, %c0_15] : memref<32x32xbf16, #tpu.memory_space<vmem>>, vector<32x32xbf16>
    %cst_16 = arith.constant dense<0.000000e+00> : vector<8x32xf32>
    %16 = tpu.matmul %13, %15, %cst_16 {dimension_numbers = #tpu.dot_dimension_numbers<[1], [0], [0], [1], [0, 0, 1, 1], [], []>} : vector<8x32xbf16>, vector<32x32xbf16>, vector<8x32xf32> -> vector<8x32xf32>
    %17 = arith.addf %14, %16 : vector<8x32xf32>
    %c0_17 = arith.constant 0 : index
    %c0_18 = arith.constant 0 : index
    %18 = vector.load %arg16[%c0_17, %c0_18] : memref<8x32xf32, #tpu.memory_space<vmem>>, vector<8x32xf32>
    tpu.vector_store %arg16[%c0_17, %c0_18], %17 {strides = array<i32>} : memref<8x32xf32, #tpu.memory_space<vmem>>, vector<8x32xf32>,
    %c0_19 = arith.constant 0 : index
    %c0_20 = arith.constant 0 : index
    %c0_21 = arith.constant 0 : index
    %19 = vector.load %arg5[%c0_19, %c0_20, %c0_21] : memref<1x8x32xf32, #tpu.memory_space<vmem>>, vector<1x8x32xf32>
    %20 = vector.shape_cast %19 : vector<1x8x32xf32> to vector<8x32xf32>
    %21 = arith.truncf %20 : vector<8x32xf32> to vector<8x32xbf16>
    %c0_22 = arith.constant 0 : index
    %c0_23 = arith.constant 0 : index
    %22 = vector.load %arg17[%c0_22, %c0_23] : memref<8x32xf32, #tpu.memory_space<vmem>>, vector<8x32xf32>
    %c0_24 = arith.constant 0 : index
    %c0_25 = arith.constant 0 : index
    %23 = vector.load %arg8[%c0_24, %c0_25] : memref<32x32xbf16, #tpu.memory_space<vmem>>, vector<32x32xbf16>
    %cst_26 = arith.constant dense<0.000000e+00> : vector<8x32xf32>
    %24 = tpu.matmul %21, %23, %cst_26 {dimension_numbers = #tpu.dot_dimension_numbers<[1], [0], [0], [1], [0, 0, 1, 1], [], []>} : vector<8x32xbf16>, vector<32x32xbf16>, vector<8x32xf32> -> vector<8x32xf32>
    %25 = arith.addf %22, %24 : vector<8x32xf32>
    %c0_27 = arith.constant 0 : index
    %c0_28 = arith.constant 0 : index
    %26 = vector.load %arg17[%c0_27, %c0_28] : memref<8x32xf32, #tpu.memory_space<vmem>>, vector<8x32xf32>
    tpu.vector_store %arg17[%c0_27, %c0_28], %25 {strides = array<i32>} : memref<8x32xf32, #tpu.memory_space<vmem>>, vector<8x32xf32>,
    %c0_i32_29 = arith.constant 0 : i32
    %27 = arith.cmpi eq, %arg2, %c0_i32_29 : i32
    %28 = arith.extui %27 : i1 to i32
    %c0_i32_30 = arith.constant 0 : i32
    %29 = arith.cmpi ne, %28, %c0_i32_30 : i32
    scf.if %29 {
      %c0_31 = arith.constant 0 : index
      %c0_32 = arith.constant 0 : index
      %30 = vector.load %arg15[%c0_31, %c0_32] : memref<8x32xf32, #tpu.memory_space<vmem>>, vector<8x32xf32>
      %c0_33 = arith.constant 0 : index
      %c0_34 = arith.constant 0 : index
      %31 = vector.load %arg9[%c0_33, %c0_34] : memref<1x32xf32, #tpu.memory_space<vmem>>, vector<1x32xf32>
      %32 = vector.broadcast %31 : vector<1x32xf32> to vector<8x32xf32>
      %33 = arith.addf %30, %32 : vector<8x32xf32>
      %34 = arith.truncf %33 : vector<8x32xf32> to vector<8x32xbf16>
      %c0_35 = arith.constant 0 : index
      %c0_36 = arith.constant 0 : index
      %c0_37 = arith.constant 0 : index
      %35 = vector.load %arg12[%c0_35, %c0_36, %c0_37] : memref<1x8x32xbf16, #tpu.memory_space<vmem>>, vector<1x8x32xbf16>
      %36 = vector.shape_cast %35 : vector<1x8x32xbf16> to vector<8x32xbf16>
      %37 = vector.shape_cast %34 : vector<8x32xbf16> to vector<1x8x32xbf16>
      tpu.vector_store %arg12[%c0_35, %c0_36, %c0_37], %37 {strides = array<i32>} : memref<1x8x32xbf16, #tpu.memory_space<vmem>>, vector<1x8x32xbf16>,
      %c0_38 = arith.constant 0 : index
      %c0_39 = arith.constant 0 : index
      %38 = vector.load %arg16[%c0_38, %c0_39] : memref<8x32xf32, #tpu.memory_space<vmem>>, vector<8x32xf32>
      %c0_40 = arith.constant 0 : index
      %c0_41 = arith.constant 0 : index
      %39 = vector.load %arg10[%c0_40, %c0_41] : memref<1x32xf32, #tpu.memory_space<vmem>>, vector<1x32xf32>
      %40 = vector.broadcast %39 : vector<1x32xf32> to vector<8x32xf32>
      %41 = arith.addf %38, %40 : vector<8x32xf32>
      %42 = arith.truncf %41 : vector<8x32xf32> to vector<8x32xbf16>
      %c0_42 = arith.constant 0 : index
      %c0_43 = arith.constant 0 : index
      %c0_44 = arith.constant 0 : index
      %43 = vector.load %arg13[%c0_42, %c0_43, %c0_44] : memref<1x8x32xbf16, #tpu.memory_space<vmem>>, vector<1x8x32xbf16>
      %44 = vector.shape_cast %43 : vector<1x8x32xbf16> to vector<8x32xbf16>
      %45 = vector.shape_cast %42 : vector<8x32xbf16> to vector<1x8x32xbf16>
      tpu.vector_store %arg13[%c0_42, %c0_43, %c0_44], %45 {strides = array<i32>} : memref<1x8x32xbf16, #tpu.memory_space<vmem>>, vector<1x8x32xbf16>,
      %c0_45 = arith.constant 0 : index
      %c0_46 = arith.constant 0 : index
      %46 = vector.load %arg17[%c0_45, %c0_46] : memref<8x32xf32, #tpu.memory_space<vmem>>, vector<8x32xf32>
      %c0_47 = arith.constant 0 : index
      %c0_48 = arith.constant 0 : index
      %47 = vector.load %arg11[%c0_47, %c0_48] : memref<1x32xf32, #tpu.memory_space<vmem>>, vector<1x32xf32>
      %48 = vector.broadcast %47 : vector<1x32xf32> to vector<8x32xf32>
      %49 = arith.addf %46, %48 : vector<8x32xf32>
      %50 = arith.truncf %49 : vector<8x32xf32> to vector<8x32xbf16>
      %c0_49 = arith.constant 0 : index
      %c0_50 = arith.constant 0 : index
      %c0_51 = arith.constant 0 : index
      %51 = vector.load %arg14[%c0_49, %c0_50, %c0_51] : memref<1x8x32xbf16, #tpu.memory_space<vmem>>, vector<1x8x32xbf16>
      %52 = vector.shape_cast %51 : vector<1x8x32xbf16> to vector<8x32xbf16>
      %53 = vector.shape_cast %50 : vector<8x32xbf16> to vector<1x8x32xbf16>
      tpu.vector_store %arg14[%c0_49, %c0_50, %c0_51], %53 {strides = array<i32>} : memref<1x8x32xbf16, #tpu.memory_space<vmem>>, vector<1x8x32xbf16>,
    } else {
    }
    return
  }
  func.func @transform_0(%arg0: i32, %arg1: i32, %arg2: i32) -> (i32, i32, i32) {
    %c0_i32 = arith.constant 0 : i32
    return %arg0, %arg1, %arg2 : i32, i32, i32
  }
  func.func @transform_1(%arg0: i32, %arg1: i32, %arg2: i32) -> (i32, i32, i32) {
    %c0_i32 = arith.constant 0 : i32
    return %arg0, %arg1, %arg2 : i32, i32, i32
  }
  func.func @transform_2(%arg0: i32, %arg1: i32, %arg2: i32) -> (i32, i32, i32) {
    %c0_i32 = arith.constant 0 : i32
    return %arg0, %arg1, %arg2 : i32, i32, i32
  }
  func.func @transform_3(%arg0: i32, %arg1: i32, %arg2: i32) -> (i32, i32) {
    %c0_i32 = arith.constant 0 : i32
    %c0_i32_0 = arith.constant 0 : i32
    return %arg2, %c0_i32 : i32, i32
  }
  func.func @transform_4(%arg0: i32, %arg1: i32, %arg2: i32) -> (i32, i32) {
    %c0_i32 = arith.constant 0 : i32
    %c0_i32_0 = arith.constant 0 : i32
    return %arg2, %c0_i32 : i32, i32
  }
  func.func @transform_5(%arg0: i32, %arg1: i32, %arg2: i32) -> (i32, i32) {
    %c0_i32 = arith.constant 0 : i32
    %c0_i32_0 = arith.constant 0 : i32
    return %arg2, %c0_i32 : i32, i32
  }
  func.func @transform_6(%arg0: i32, %arg1: i32, %arg2: i32) -> (i32, i32) {
    %c0_i32 = arith.constant 0 : i32
    %c0_i32_0 = arith.constant 0 : i32
    %c0_i32_1 = arith.constant 0 : i32
    return %c0_i32, %c0_i32_0 : i32, i32
  }
  func.func @transform_7(%arg0: i32, %arg1: i32, %arg2: i32) -> (i32, i32) {
    %c0_i32 = arith.constant 0 : i32
    %c0_i32_0 = arith.constant 0 : i32
    %c0_i32_1 = arith.constant 0 : i32
    return %c0_i32, %c0_i32_0 : i32, i32
  }
  func.func @transform_8(%arg0: i32, %arg1: i32, %arg2: i32) -> (i32, i32) {
    %c0_i32 = arith.constant 0 : i32
    %c0_i32_0 = arith.constant 0 : i32
    %c0_i32_1 = arith.constant 0 : i32
    return %c0_i32, %c0_i32_0 : i32, i32
  }
  func.func @transform_9(%arg0: i32, %arg1: i32, %arg2: i32) -> (i32, i32, i32) {
    %c0_i32 = arith.constant 0 : i32
    %c0_i32_0 = arith.constant 0 : i32
    return %arg0, %arg1, %c0_i32 : i32, i32, i32
  }
  func.func @transform_10(%arg0: i32, %arg1: i32, %arg2: i32) -> (i32, i32, i32) {
    %c0_i32 = arith.constant 0 : i32
    %c0_i32_0 = arith.constant 0 : i32
    return %arg0, %arg1, %c0_i32 : i32, i32, i32
  }
  func.func @transform_11(%arg0: i32, %arg1: i32, %arg2: i32) -> (i32, i32, i32) {
    %c0_i32 = arith.constant 0 : i32
    %c0_i32_0 = arith.constant 0 : i32
    return %arg0, %arg1, %c0_i32 : i32, i32, i32
  }
}

</mosaic_0001>

<bundles_post_ra>
// kernel: tpu_custom_call.1
= control target key start
LH: loop header
LB: loop body
LE: loop exit
PB: predicated region body
PF: predicated region fallthrough
CT: control target
= control target key end

     0   :  { %s2052_s0 = inlined_call_operand.hbm [shape: f32[2,8,32], index: 0, kind: input, shape index: {}]   ;;  %s2053_s1 = inlined_call_operand.hbm [shape: f32[2,8,32], index: 1, kind: input, shape index: {}]   ;;  %s2054_s2 = inlined_call_operand.hbm [shape: f32[2,8,32], index: 2, kind: input, shape index: {}]   ;;  %s2055_s3 = inlined_call_operand.hbm [shape: bf16[32,32], index: 3, kind: input, shape index: {}]   ;;  %s2056_s4 = inlined_call_operand.hbm [shape: bf16[32,32], index: 4, kind: input, shape index: {}]   ;;  %s2057_s5 = inlined_call_operand.hbm [shape: bf16[32,32], index: 5, kind: input, shape index: {}]   ;;  %s2058_s6 = inlined_call_operand.vmem [shape: f32[1,32], index: 6, kind: input, shape index: {}]   ;;  %s2059_s7 = inlined_call_operand.vmem [shape: f32[1,32], index: 7, kind: input, shape index: {}]   ;;  %s2060_s8 = inlined_call_operand.vmem [shape: f32[1,32], index: 8, kind: input, shape index: {}]   ;;  %s2061_s9 = inlined_call_operand.hbm [shape: bf16[2,8,32], index: 9, kind: output, shape index: {0}]   ;;  %s2062_s10 = inlined_call_operand.hbm [shape: bf16[2,8,32], index: 10, kind: output, shape index: {1}]   ;;  %s2063_s11 = inlined_call_operand.hbm [shape: bf16[2,8,32], index: 11, kind: output, shape index: {2}]  }
   0x1   :  { %2084 = sst [smem:[#allocation32_spill]] %s2053_s1 }
   0x2   :  { %2085 = sst [smem:[#allocation33_spill]] %s2055_s3 }
   0x3   :  { %2086 = sst [smem:[#allocation34_spill]] %s2056_s4 }
   0x4   :  { %2087 = sst [smem:[#allocation35_spill]] %s2060_s8 }
   0x5   :  { %2088 = sst [smem:[#allocation36_spill]] %s2062_s10 }
   0x6   :  { %2089 = sst [smem:[#allocation37_spill]] %s2063_s11 }
   0x7   :  { %17 = vsyncpa [#allocation6], 0 }
   0x8   :  { %19 = vsyncpa [#allocation6 + $0x1], 0 }
   0x9   :  { %20 = vsyncpa [#allocation9], 0 }
   0xa   :  { %22 = vsyncpa [#allocation9 + $0x1], 0 }
   0xb   :  { %23 = vsyncpa [#allocation12], 0 }
   0xc   :  { %24 = vsyncpa [#allocation15], 0 }
   0xd   :  { %25 = vsyncpa [#allocation7], 0 }
   0xe   :  { %27 = vsyncpa [#allocation7 + $0x1], 0 }
   0xf   :  { %28 = vsyncpa [#allocation18], 0 }
  0x10   :  { %30 = vsyncpa [#allocation18 + $0x1], 0  ;;  %s1710_s17 = smov 0   ;;  %s1712_s18 = smov 0  }
  0x11   :  { %s1714_s19 = smov 0   ;;  %s1716_s20 = smov 0  }
  0x12   :  { %s1718_s21 = smov 0   ;;  %s1720_s22 = smov 0  }
  0x13 LB: > { %2090 = sst [smem:[#allocation26_spill]] %s1615_s17  ;;  %s1741_s23 = sadd.s32 4294967295, %s1635_s22   ;;  %s1635_s22 = sphi %s1720_s22, %s36_s22   ;;  %s1631_s21 = sphi %s1718_s21, %s2133_s21   ;;  %s1627_s20 = sphi %s1716_s20, %s2132_s20   ;;  %s1623_s19 = sphi %s1714_s19, %s2136_s19   ;;  %s1619_s18 = sphi %s1712_s18, %s2135_s18   ;;  %s1615_s17 = sphi %s1710_s17, %s2134_s17  }
  0x14   : > { %2091 = sst [smem:[#allocation27_spill]] %s1631_s21  ;;  %s2064_s24 = sadd.s32 4294967294, %s1635_s22  }
  0x15   : > { %2092 = sst [smem:[#allocation28_spill]] %s1635_s22  ;;  %p79_p0 = scmp.ne.s32.totalorder %s1619_s18, %s1615_s17 }
  0x16   : > { %p2078_p1 = scmp.eq.s32.totalorder %s1741_s23, 0  ;;  %p312_p3 = scmp.eq.s32.totalorder %s2064_s24, 1 }
  0x17   : > { %p1128_p5 = scmp.ge.s32.totalorder %s1635_s22, 1  ;;  %p375_p7 = scmp.lt.s32.totalorder %s1635_s22, 3 }
  0x18   : > { %p1752_p4 = por %p2078_p1, %p79_p0  ;;  %p1757_p6 = por %p312_p3, %p79_p0 }
  0x19   : > { %p1762_p8 = pnand %p1128_p5, %p375_p7  ;;  %s1637_s28 = smov [#allocation11]  }
  0x1a   : > { %s2093_s25 = scalar_select %p1752_p4, 1, 0 }
  0x1b   : > { %s2094_s26 = scalar_select %p1757_p6, 1, 0 }
  0x1c   : > { %s2096_s27 = scalar_select %p1762_p8, 1, 0 }
  0x1d   : > { %2095 = sst [smem:[#allocation29_spill]] %s2094_s26  ;;  %s390_s29 = sshll.u32 %s1637_s28, 4  ;;  %s391_s29 = int_to_ptr.vmem [resolvable:$true] %s390_s29 }
  0x1e   : > { %p1226_p9 = pneg %p1762_p8  ;;  %s55_s12 = sadd.s32 1, %s1631_s21 }
  0x1f   : > { %s1336_s13 = scalar_lea.vmem %s391_s29, 256  ;;  %p1344_p5 = scmp.lt.s32.totalorder %s391_s29, %s391_s29 }
  0x20   : > { %p1771_p11 = pnand %p1226_p9, %p2078_p1  ;;  %p1337_p13 = scmp.ne.s32.totalorder %s391_s29, %s1336_s13 }
  0x21   : > { %p1345_p7 = scmp.lt.s32.totalorder %s1336_s13, %s1336_s13 }
  0x22   : > { %p2079_p12 = pneg %p1771_p11 }
  0x23   : > { %p1346_p2 = por %p1345_p7, %p1344_p5 }
  0x24   : > { %p1339_p0 = pnand %p1337_p13, %p2079_p12 }
  0x26   : > { %p1340_p3 = pneg %p1339_p0 }
  0x28   : > { %p1347_p10 = pnand %p1346_p2, %p1340_p3 }
  0x2a   : > { %1350 = shalt.err (!%p1347_p10)
}
  0x2b   : > { %s2067_s14 = smov 64   ;;  %s2069_s15 = smov 4  }
  0x2c   : > { %s2098_s3 = sld [smem:[#allocation33_spill]]  ;;  %p57_p2 = scmp.ge.s32.totalorder %s55_s12, 2 }
  0x2d   : > { %s66_s13 = sadd.s32 1, %s1623_s19  ;;  %p73_p9 = scmp.ne.s32.totalorder %s1623_s19, %s1619_s18 }
  0x2e   : > { %p74_p10 = scmp.eq.s32.totalorder %s1635_s22, 0  ;;  %s2138_s12 = smov (%p57_p2, %s55_s12), 0 }
  0x2f   : > { %2099 = sst [smem:[#allocation30_spill]] %s2138_s12  ;;  %p2100_p0 = scmp.eq.s32.totalorder %s1741_s23, 1 }
  0x30   : > { %p75_p13 = por %p74_p10, %p73_p9  ;;  %s59_s26 = ssub.s32 %s1631_s21, %s2138_s12 }
  0x31   : > { %p1797_p3 = por %p2100_p0, %p73_p9  ;;  %p1259_p5 = scmp.lt.s32.totalorder %s1635_s22, 2 }
  0x32   : > { %1229 = dma.hbm_to_vmem [thread:$0]  (!%p1771_p11), %s2098_s3, 256, %s391_s29, [#allocation12], %s2067_s14, %s2067_s14, %s2069_s15  }
  0x33   : > { %s2101_s24 = scalar_select %p1797_p3, 1, 0 }
  0x34   : > { %p64_p7 = scmp.eq.s32.totalorder %s59_s26, 0  ;;  %s2073_s17 = sand.u32 1, %s1623_s19  }
  0x35   : > { %s1807_s29 = sshll.u32 %s2073_s17, 3  ;;  %s1810_s16 = sshll.u32 %s1631_s21, 7 }
  0x36   : > { %s1813_s28 = scalar_select %p64_p7, %s1623_s19, %s66_s13  }
  0x37   : > { %p1815_p2 = pnand %p1259_p5, %p75_p13  ;;  %s465_s15 = sand.u32 1, %s1635_s22  }
  0x38   : > { %2102 = sst [smem:[#allocation31_spill]] %s1813_s28  ;;  %s469_s11 = scalar_lea.vmem [#allocation8], %s1807_s29 }
  0x39   : > { %s2104_s1 = sld [smem:[#allocation32_spill]]  ;;  %s478_s17 = sshll.u32 %s469_s11, 4  ;;  %s479_s17 = int_to_ptr.vmem [resolvable:$true] %s478_s17 }
  0x3a   : > { %s1640_s8 = smov [#allocation13]   ;;  %s1825_s10 = scalar_lea.sflag [#allocation9], %s465_s15 }
  0x3b   : > { %s406_s21 = sshll.u32 %s1640_s8, 4  ;;  %p2080_p9 = pneg %p1815_p2  ;;  %s407_s21 = int_to_ptr.vmem [resolvable:$true] %s406_s21 }
  0x3c   : > { %s1364_s13 = scalar_lea.vmem %s479_s17, 128  ;;  %s1641_s28 = smov [#allocation8]  }
  0x3d   : > { %p1365_p10 = scmp.ne.s32.totalorder %s479_s17, %s1364_s13  ;;  %s1369_s22 = sshll.u32 %s1641_s28, 4  ;;  %s1370_s22 = int_to_ptr.vmem [resolvable:$false] %s1369_s22 }
  0x3e   : > { %s1371_s3 = scalar_lea.vmem %s1370_s22, 256  ;;  %p1372_p5 = scmp.lt.s32.totalorder %s479_s17, %s1370_s22 }
  0x3f   : > { %s476_s26 = scalar_lea.hbm %s2104_s1, %s1810_s16  ;;  %p1367_p13 = pnand %p1365_p10, %p2080_p9 }
  0x40   : > { %p1373_p7 = scmp.lt.s32.totalorder %s1371_s3, %s1364_s13 }
  0x41   : > { %p1368_p0 = pneg %p1367_p13 }
  0x42   : > { %p1374_p1 = por %p1373_p7, %p1372_p5 }
  0x44   : > { %p1375_p12 = pnand %p1374_p1, %p1368_p0 }
  0x46   : > { %1378 = shalt.err (!%p1375_p12)
}
  0x47   : > { %1242 = dma.hbm_to_vmem [thread:$0]  (!%p1815_p2), %s476_s26, 128, %s479_s17, %s1825_s10  }
  0x48   : > { %s1390_s8 = scalar_lea.vmem %s407_s21, 256  ;;  %p2105_p10 = pneg %p1771_p11 }
  0x49   : > { %p1391_p6 = scmp.ne.s32.totalorder %s407_s21, %s1390_s8  ;;  %p1398_p3 = scmp.lt.s32.totalorder %s407_s21, %s407_s21 }
  0x4a   : > { %p1399_p4 = scmp.lt.s32.totalorder %s1390_s8, %s1390_s8 }
  0x4b   : > { %p1393_p13 = pnand %p1391_p6, %p2105_p10 }
  0x4c   : > { %p1400_p8 = por %p1399_p4, %p1398_p3 }
  0x4d   : > { %p1394_p9 = pneg %p1393_p13 }
  0x4f   : > { %p1401_p5 = pnand %p1400_p8, %p1394_p9 }
  0x51   : > { %1404 = shalt.err (!%p1401_p5)
}
  0x52   : > { %s2106_s11 = smov 4   ;;  %s2107_s22 = smov 64  }
  0x53   : > { %s2108_s4 = sld [smem:[#allocation34_spill]]  ;;  %s1642_s17 = smov [#allocation14]  }
  0x54   : > { %s422_s28 = sshll.u32 %s1642_s17, 4  ;;  %p2109_p6 = pmov %p2105_p10  ;;  %s423_s28 = int_to_ptr.vmem [resolvable:$true] %s422_s28 }
  0x55   : > { %s1416_s26 = scalar_lea.vmem %s423_s28, 256  ;;  %p1424_p12 = scmp.lt.s32.totalorder %s423_s28, %s423_s28 }
  0x56   : > { %p1417_p1 = scmp.ne.s32.totalorder %s423_s28, %s1416_s26  ;;  %p1425_p3 = scmp.lt.s32.totalorder %s1416_s26, %s1416_s26 }
  0x58   : > { %p1419_p4 = pnand %p1417_p1, %p2109_p6  ;;  %p1426_p9 = por %p1425_p3, %p1424_p12 }
  0x59   : > { %1232 = dma.hbm_to_vmem [thread:$0]  (!%p1771_p11), %s2108_s4, 256, %s407_s21, [#allocation12], %s2107_s22, %s2107_s22, %s2106_s11  }
  0x5a   : > { %p1420_p8 = pneg %p1419_p4 }
  0x5c   : > { %p1427_p0 = pnand %p1426_p9, %p1420_p8 }
  0x5e   : > { %1430 = shalt.err (!%p1427_p0)
}
  0x5f   : > { %1235 = dma.hbm_to_vmem [thread:$0]  (!%p1771_p11), %s2057_s5, 256, %s423_s28, [#allocation15], %s2107_s22, %s2107_s22, %s2106_s11  }
  0x60   : > { %s456_s12 = scalar_lea.hbm %s2052_s0, %s1810_s16  ;;  %s449_s15 = scalar_lea.vmem [#allocation5], %s1807_s29 }
  0x61   : > { %s458_s17 = sshll.u32 %s449_s15, 4  ;;  %s2110_s26 = sand.u32 1, %s1623_s19   ;;  %s459_s17 = int_to_ptr.vmem [resolvable:$true] %s458_s17 }
  0x62   : > { %s446_s30 = scalar_lea.sflag [#allocation6], %s2110_s26  ;;  %s1444_s1 = scalar_lea.vmem %s459_s17, 128 }
  0x63   : > { %p1445_p7 = scmp.ne.s32.totalorder %s459_s17, %s1444_s1  ;;  %p2111_p10 = pneg %p1815_p2 }
  0x64   : > { %s1643_s21 = smov [#allocation5]  }
  0x65   : > { %p1447_p13 = pnand %p1445_p7, %p2111_p10  ;;  %s1449_s13 = sshll.u32 %s1643_s21, 4  ;;  %s1450_s13 = int_to_ptr.vmem [resolvable:$false] %s1449_s13 }
  0x66   : > { %s1451_s4 = scalar_lea.vmem %s1450_s13, 256  ;;  %p1452_p11 = scmp.lt.s32.totalorder %s459_s17, %s1450_s13 }
  0x67   : > { %p1448_p5 = pneg %p1447_p13  ;;  %p1453_p1 = scmp.lt.s32.totalorder %s1451_s4, %s1444_s1 }
  0x69   : > { %p1454_p6 = por %p1453_p1, %p1452_p11 }
  0x6b   : > { %p1455_p4 = pnand %p1454_p6, %p1448_p5 }
  0x6d   : > { %1458 = shalt.err (!%p1455_p4)
}
  0x6e   : > { %1239 = dma.hbm_to_vmem [thread:$0]  (!%p1815_p2), %s456_s12, 128, %s459_s17, %s446_s30  }
  0x6f   : > { %s496_s28 = scalar_lea.hbm %s2054_s2, %s1810_s16  ;;  %s489_s3 = scalar_lea.vmem [#allocation10], %s1807_s29 }
  0x70   : > { %s498_s8 = sshll.u32 %s489_s3, 4  ;;  %p2112_p12 = pmov %p2111_p10  ;;  %s499_s8 = int_to_ptr.vmem [resolvable:$true] %s498_s8 }
  0x71   : > { %s1472_s15 = scalar_lea.vmem %s499_s8, 128  ;;  %s1644_s1 = smov [#allocation10]  }
  0x72   : > { %p1473_p8 = scmp.ne.s32.totalorder %s499_s8, %s1472_s15  ;;  %s1477_s4 = sshll.u32 %s1644_s1, 4  ;;  %s1478_s4 = int_to_ptr.vmem [resolvable:$false] %s1477_s4 }
  0x73   : > { %s1479_s26 = scalar_lea.vmem %s1478_s4, 256  ;;  %p1480_p0 = scmp.lt.s32.totalorder %s499_s8, %s1478_s4 }
  0x74   : > { %p1475_p3 = pnand %p1473_p8, %p2112_p12  ;;  %p1481_p7 = scmp.lt.s32.totalorder %s1479_s26, %s1472_s15 }
  0x76   : > { %p1476_p9 = pneg %p1475_p3  ;;  %p1482_p10 = por %p1481_p7, %p1480_p0 }
  0x78   : > { %p1483_p13 = pnand %p1482_p10, %p1476_p9 }
  0x7a   : > { %1486 = shalt.err (!%p1483_p13)
}
  0x7b   : > { %1245 = dma.hbm_to_vmem [thread:$0]  (!%p1815_p2), %s496_s28, 128, %s499_s8, %s1825_s10  }
  0x7c   : > { %p2113_p5 = scmp.ne.s32.totalorder %s2096_s27, 0 }
  0x7d   : > { %s1883_s29 = sand.u32 (!%p2113_p5), 1, %s1619_s18   ;;  %p2114_p11 = scmp.ne.s32.totalorder (!%p2113_p5), %s2093_s25, 0 }
  0x7e   : > { %507 = sbr.rel (%p2113_p5) target bundleno = 417 (0x1a1), region = 56  ;;  %s1886_s16 = sshll.u32 (!%p2113_p5), %s1883_s29, 3 }
  0x7f   : > { %s510_s12 = scalar_lea.sflag (!%p2113_p5), [#allocation6], %s1883_s29  ;;  %s513_s17 = scalar_lea.vmem (!%p2113_p5), [#allocation5], %s1886_s16 }
  0x83   : > { %1590 = dma.done.wait (%p2114_p11), %s510_s12, 128  }
  0x84   : > { %1592 = vsyncadd (%p2114_p11), %s510_s12, 4294967168  ;;  %s518_s10 = sand.u32 1, %s1741_s23   ;;  %s522_s14 = scalar_lea.vmem [#allocation8], %s1886_s16 }
  0x85   : > { %s519_s27 = scalar_lea.sflag [#allocation9], %s518_s10 }
  0x86   : > { %1594 = dma.done.wait (%p2114_p11), %s519_s27, 256  }
  0x87   : > { %1596 = vsyncadd (%p2114_p11), %s519_s27, 4294967040  ;;  %s531_s30 = scalar_lea.vmem [#allocation10], %s1886_s16  ;;  %p2115_p2 = scmp.eq.s32.totalorder %s1741_s23, 0 }
  0x89   : > { %1598 = dma.done.wait (%p2115_p2), [#allocation12], 512   ;;  %p2116_p1 = pmov %p2115_p2 }
  0x8b   : > { %1600 = vsyncadd (%p2116_p1), [#allocation12], 4294966784  ;;  %p2117_p6 = pmov %p2116_p1 }
  0x8c   : > { %p2118_p4 = pmov %p2116_p1 }
  0x8d   : > { %1602 = dma.done.wait (%p2117_p6), [#allocation15], 256  }
  0x8e   : > { %1604 = vsyncadd (%p2118_p4), [#allocation15], 4294967040  ;;  %vm610_vm0 = vcmask 261120   ;;  %v1645_v0 = vmov 0.0   ;;  %vm1646_vm1 = vmmov 0   ;;  %v1319_v1 = vld [vmem:[#allocation11 + $0x8] sm:$0xff]  }
  0x8f   : > { %1178 = vmatprep.subr.bf16.mxu0 %v1645_v0  ;;  %1186 = vmatprep.subr.bf16.mxu1 %v1645_v0  ;;  %611 = vst.msk [vmem:[#allocation2] sm:$0xff] %vm610_vm0, %v1645_v0  ;;  %612 = vst.msk [vmem:[#allocation3] sm:$0xff] %vm610_vm0, %v1645_v0  ;;  %v1320_v2 = vld [vmem:[#allocation13 + $0x8] sm:$0xff]   ;;  %v1321_v3 = vld [vmem:[#allocation11] sm:$0xff]   ;;  %s1927_s25 = sshll.u32 %s1883_s29, 2  ;;  %s1936_s28 = sshll.u32 %s1627_s20, 6 }
  0x90   : > { %613 = vst.msk [vmem:[#allocation4] sm:$0xff] %vm610_vm0, %v1645_v0  ;;  %1182 = vmatprep.mubr.msk.bf16.mxu0 %vm1646_vm1, %v1645_v0  ;;  %1190 = vmatprep.mubr.msk.bf16.mxu1 %vm1646_vm1, %v1645_v0  ;;  %v1322_v4 = vld [vmem:[#allocation13] sm:$0xff]   ;;  %v679_v7 = vld [vmem:[%s522_s14] sm:$0xff]  ;;  %v1158_v27 = vld [vmem:[%s2058_s6] ss:$0 sm:$0xff]  ;;  %s587_s3 = scalar_lea.vmem [#allocation16], %s1927_s25  ;;  %s1945_s26 = scalar_lea.hbm %s2061_s9, %s1936_s28 }
  0x91   : > { %1179 = vmatpush3.bf16.msra.mxu0 %v1319_v1  ;;  %1187 = vmatpush3.bf16.msra.mxu1 %v1320_v2  ;;  %v614_v5 = vld [vmem:[%s513_s17] sm:$0xff]  ;;  %v1323_v8 = vld [vmem:[#allocation14 + $0x8] sm:$0xff]   ;;  %v680_v9 = vpack.c.bf16 %v679_v7, %v679_v7  ;;  %v1324_v10 = vld [vmem:[#allocation14] sm:$0xff]   ;;  %s869_s8 = sshll.u32 %s587_s3, 4  ;;  %s594_s15 = scalar_lea.vmem [#allocation17], %s1927_s25  ;;  %vm820_vm2 = vcmask 257024   ;;  %s1947_s8 = int_to_ptr.vmem [resolvable:$true] %s869_s8 }
  0x92   : > { %1180 = vmatprep.subr.bf16.mxu0 %v1645_v0  ;;  %1188 = vmatprep.subr.bf16.mxu1 %v1645_v0  ;;  %v615_v6 = vpack.c.bf16 %v614_v5, %v614_v5  ;;  %v743_v11 = vld [vmem:[%s531_s30] sm:$0xff]  ;;  %s883_s1 = sshll.u32 %s594_s15, 4  ;;  %s2119_s17 = sld [smem:[#allocation36_spill]]  ;;  %s1955_s1 = int_to_ptr.vmem [resolvable:$true] %s883_s1 }
  0x93   : > { %v744_v12 = vpack.c.bf16 %v743_v11, %v743_v11  ;;  %v1159_v29 = vld [vmem:[%s2059_s7] ss:$0 sm:$0xff]  ;;  %s845_s30 = scalar_lea.sflag [#allocation7], %s1883_s29  ;;  %s1487_s21 = scalar_lea.vmem %s1947_s8, 64 }
  0x94   : > { %p1488_p8 = scmp.ne.s32.totalorder %s1947_s8, %s1487_s21  ;;  %p2121_p12 = scmp.ne.s32.totalorder %s2101_s24, 0 }
  0x95   : > { %1181 = vmatpush3.bf16.msra.mxu0 %v1321_v3  ;;  %1189 = vmatpush3.bf16.msra.mxu1 %v1322_v4  ;;  %s1647_s13 = smov [#allocation16]  }
  0x96   : > { %1194 = vmatprep.subr.bf16.mxu0 %v1645_v0  ;;  %v616_v13 = vld [vmem:[#allocation2] sm:$0xff]  ;;  %v681_v14 = vld [vmem:[#allocation3] sm:$0xff]  ;;  %p1489_p3 = pnand %p1488_p8, %p2121_p12  ;;  %s1491_s11 = sshll.u32 %s1647_s13, 4  ;;  %s1492_s11 = int_to_ptr.vmem [resolvable:$false] %s1491_s11 }
  0x97   : > { %v745_v24 = vld [vmem:[#allocation4] sm:$0xff]  ;;  %s1493_s22 = scalar_lea.vmem %s1492_s11, 128  ;;  %p1494_p0 = scmp.lt.s32.totalorder %s1947_s8, %s1492_s11 }
  0x98   : > { %1183 = vmatmul.mubr.msk.bf16.vlgmr.msra.gmra.mxu0 %vm610_vm0, %v615_v6  ;;  %1191 = vmatmul.mubr.msk.bf16.vlgmr.msra.gmra.mxu1 %vm610_vm0, %v680_v9  ;;  %s2120_s27 = smov %s2119_s17  ;;  %s1953_s14 = scalar_lea.hbm %s2119_s17, %s1936_s28 }
  0x99   : > { %1195 = vmatpush3.bf16.msra.mxu0 %v1323_v8  ;;  %1198 = vmatprep.mubr.msk.bf16.mxu0 %vm1646_vm1, %v1645_v0  ;;  %p1490_p9 = pneg %p1489_p3  ;;  %p1495_p7 = scmp.lt.s32.totalorder %s1493_s22, %s1487_s21 }
  0x9a   : > { %1196 = vmatprep.subr.bf16.mxu0 %v1645_v0 }
  0x9b   : > { %p1496_p10 = por %p1495_p7, %p1494_p0 }
  0x9d   : > { %1197 = vmatpush3.bf16.msra.mxu0 %v1324_v10  ;;  %p1497_p13 = pnand %p1496_p10, %p1490_p9 }
  0xa0   : > { %1199 = vmatmul.mubr.msk.bf16.vlgmr.msra.gmra.mxu0 %vm610_vm0, %v744_v12 }
 0x158   : > { %v671_v15 = vpop.f32.mrf.mxu0  ;;  %v735_v17 = vpop.f32.mrf.mxu1 }
 0x159   : > { %v677_v16 = vadd.f32 %v671_v15, %v616_v13  ;;  %v741_v19 = vadd.f32 %v735_v17, %v681_v14 }
 0x15a   : > { %v1184_v18 = vpop.f32.mrf.mxu0  ;;  %v1192_v20 = vpop.f32.mrf.mxu1 }
 0x15b   : > { %678 = vst.msk [vmem:[#allocation2] sm:$0xff] %vm610_vm0, %v677_v16  ;;  %742 = vst.msk [vmem:[#allocation3] sm:$0xff] %vm610_vm0, %v741_v19 }
 0x15c   : > { %v674_v21 = vpop.f32.mrf.mxu0  ;;  %v738_v22 = vpop.f32.mrf.mxu1 }
 0x15e   : > { %v1185_v23 = vpop.f32.mrf.mxu0  ;;  %v1193_v25 = vpop.f32.mrf.mxu1 }
 0x160   : > { %v799_v26 = vpop.f32.mrf.mxu0 }
 0x161   : > { %v805_v28 = vadd.f32 %v799_v26, %v745_v24 }
 0x162   : > { %v1200_v30 = vpop.f32.mrf.mxu0  ;;  %v810_v31 = vld [vmem:[#allocation2] sm:$0xff]  ;;  %v822_v32 = vld [vmem:[#allocation3] sm:$0xff] }
 0x163   : > { %806 = vst.msk [vmem:[#allocation4] sm:$0xff] %vm610_vm0, %v805_v28  ;;  %v818_v33 = vadd.f32 %v1158_v27, %v810_v31  ;;  %v830_v35 = vadd.f32 %v1159_v29, %v822_v32 }
 0x164   : > { %v802_v34 = vpop.f32.mrf.mxu0 }
 0x165   : > { %v819_v36 = vpack.c.bf16 %v818_v33, %v818_v33  ;;  %v831_v38 = vpack.c.bf16 %v830_v35, %v830_v35 }
 0x166   : > { %v1201_v37 = vpop.f32.mrf.mxu0 }
 0x167   : > { %821 = vst.msk [vmem:[%s587_s3] sm:$0xf] %vm820_vm2, %v819_v36  ;;  %832 = vst.msk [vmem:[%s594_s15] sm:$0xf] %vm820_vm2, %v831_v38 }
 0x168   : > { %1500 = shalt.err (!%p1497_p13)
}
 0x169   : > { %s1501_s3 = scalar_lea.hbm %s1945_s26, 64  ;;  %s1505_s4 = scalar_lea.hbm %s2061_s9, 128 }
 0x16a   : > { %p1502_p5 = scmp.ne.s32.totalorder %s1945_s26, %s1501_s3  ;;  %p1506_p1 = scmp.lt.s32.totalorder %s1945_s26, %s2061_s9 }
 0x16b   : > { %p1507_p6 = scmp.lt.s32.totalorder %s1505_s4, %s1501_s3 }
 0x16c   : > { %p1503_p11 = pnand %p1502_p5, %p2121_p12 }
 0x16d   : > { %p1508_p4 = por %p1507_p6, %p1506_p1 }
 0x16e   : > { %p1504_p2 = pneg %p1503_p11 }
 0x170   : > { %p1509_p8 = pnand %p1508_p4, %p1504_p2 }
 0x172   : > { %1512 = shalt.err (!%p1509_p8)
}
 0x173   : > { %1220 = dma.vmem_to_hbm [thread:$0]  (%p2121_p12), %s1947_s8, 64, %s1945_s26, %s845_s30  }
 0x174   : > { %s2122_s21 = sld [smem:[#allocation35_spill]]  ;;  %s1985_s13 = scalar_lea.sflag [#allocation18], %s518_s10 }
 0x175   : > { %s1513_s11 = scalar_lea.vmem %s1955_s1, 64  ;;  %s1648_s22 = smov [#allocation17]  }
 0x176   : > { %p1514_p3 = scmp.ne.s32.totalorder %s1955_s1, %s1513_s11  ;;  %s1517_s3 = sshll.u32 %s1648_s22, 4  ;;  %s1518_s3 = int_to_ptr.vmem [resolvable:$false] %s1517_s3 }
 0x177   : > { %s1519_s29 = scalar_lea.vmem %s1518_s3, 128  ;;  %p1520_p7 = scmp.lt.s32.totalorder %s1955_s1, %s1518_s3 }
 0x178   : > { %p1515_p9 = pnand %p1514_p3, %p2121_p12  ;;  %p1521_p10 = scmp.lt.s32.totalorder %s1519_s29, %s1513_s11 }
 0x17a   : > { %v1160_v39 = vld [vmem:[%s2122_s21] ss:$0 sm:$0xff]  ;;  %p1516_p0 = pneg %p1515_p9  ;;  %p1522_p13 = por %p1521_p10, %p1520_p7 }
 0x17c   : > { %p1523_p5 = pnand %p1522_p13, %p1516_p0 }
 0x17e   : > { %1526 = shalt.err (!%p1523_p5)
}
 0x17f   : > { %s1527_s23 = scalar_lea.hbm %s1953_s14, 64  ;;  %s1531_s26 = scalar_lea.hbm %s2120_s27, 128 }
 0x180   : > { %p1528_p11 = scmp.ne.s32.totalorder %s1953_s14, %s1527_s23  ;;  %p1532_p6 = scmp.lt.s32.totalorder %s1953_s14, %s2120_s27 }
 0x181   : > { %p1533_p4 = scmp.lt.s32.totalorder %s1531_s26, %s1527_s23 }
 0x182   : > { %p1529_p2 = pnand %p1528_p11, %p2121_p12 }
 0x183   : > { %p1534_p8 = por %p1533_p4, %p1532_p6 }
 0x184   : > { %p1530_p1 = pneg %p1529_p2 }
 0x186   : > { %p1535_p3 = pnand %p1534_p8, %p1530_p1 }
 0x188   : > { %1538 = shalt.err (!%p1535_p3)
}
 0x189   : > { %1221 = dma.vmem_to_hbm [thread:$0]  (%p2121_p12), %s1955_s1, 64, %s1953_s14, %s1985_s13   ;;  %v833_v40 = vld [vmem:[#allocation4] sm:$0xff] }
 0x18a   : > { %s601_s4 = scalar_lea.vmem [#allocation19], %s1927_s25  ;;  %v841_v41 = vadd.f32 %v1160_v39, %v833_v40  ;;  %s2123_s17 = sld [smem:[#allocation37_spill]] }
 0x18b   : > { %s897_s20 = sshll.u32 %s601_s4, 4  ;;  %s1649_s3 = smov [#allocation19]   ;;  %s898_s20 = int_to_ptr.vmem [resolvable:$true] %s897_s20 }
 0x18c   : > { %v842_v42 = vpack.c.bf16 %v841_v41, %v841_v41  ;;  %s1539_s22 = scalar_lea.vmem %s898_s20, 64  ;;  %s1543_s29 = sshll.u32 %s1649_s3, 4  ;;  %s1544_s29 = int_to_ptr.vmem [resolvable:$false] %s1543_s29 }
 0x18d   : > { %p1540_p9 = scmp.ne.s32.totalorder %s898_s20, %s1539_s22  ;;  %s1545_s1 = scalar_lea.vmem %s1544_s29, 128 }
 0x18e   : > { %843 = vst.msk [vmem:[%s601_s4] sm:$0xf] %vm820_vm2, %v842_v42  ;;  %p1546_p10 = scmp.lt.s32.totalorder %s898_s20, %s1544_s29  ;;  %p1547_p13 = scmp.lt.s32.totalorder %s1545_s1, %s1539_s22 }
 0x18f   : > { %p1541_p0 = pnand %p1540_p9, %p2121_p12 }
 0x190   : > { %s2124_s11 = smov %s2123_s17  ;;  %s895_s21 = scalar_lea.hbm %s2123_s17, %s1936_s28 }
 0x191   : > { %p1542_p7 = pneg %p1541_p0  ;;  %p1548_p5 = por %p1547_p13, %p1546_p10 }
 0x193   : > { %p1549_p11 = pnand %p1548_p5, %p1542_p7 }
 0x195   : > { %1552 = shalt.err (!%p1549_p11)
}
 0x196   : > { %s1553_s25 = scalar_lea.hbm %s895_s21, 64  ;;  %s1557_s23 = scalar_lea.hbm %s2124_s11, 128 }
 0x197   : > { %p1554_p2 = scmp.ne.s32.totalorder %s895_s21, %s1553_s25  ;;  %p1558_p4 = scmp.lt.s32.totalorder %s895_s21, %s2124_s11 }
 0x198   : > { %p1559_p8 = scmp.lt.s32.totalorder %s1557_s23, %s1553_s25 }
 0x199   : > { %p1555_p1 = pnand %p1554_p2, %p2121_p12 }
 0x19a   : > { %p1560_p3 = por %p1559_p8, %p1558_p4 }
 0x19b   : > { %p1556_p6 = pneg %p1555_p1 }
 0x19d   : > { %p1561_p9 = pnand %p1560_p3, %p1556_p6 }
 0x19f   : > { %1564 = shalt.err (!%p1561_p9)
}
 0x1a0   : > { %1222 = dma.vmem_to_hbm [thread:$0]  (%p2121_p12), %s898_s20, 64, %s895_s21, %s1985_s13  }
 0x1a1 PF: > { %s2125_s26 = sld [smem:[#allocation26_spill]] }
 0x1a2   : > { %s2126_s30 = sld [smem:[#allocation29_spill]] }
 0x1a3   : > { %s2127_s15 = sld [smem:[#allocation28_spill]] }
 0x1a7   : > { %s909_s4 = sand.u32 1, %s2125_s26  }
 0x1a8   : > { %p2128_p0 = scmp.ne.s32.totalorder %s2126_s30, 0  ;;  %s910_s16 = scalar_lea.sflag [#allocation7], %s909_s4 }
 0x1a9   : > { %p2129_p7 = scmp.ge.s32.totalorder %s2127_s15, 2 }
 0x1ab   : > { %p1247_p10 = pnand %p2129_p7, %p2128_p0 }
 0x1ad   : > { %p1248_p13 = pneg %p1247_p10 }
 0x1af   : > { %1606 = dma.done.wait (%p1248_p13), %s910_s16, 64  }
 0x1b0   : > { %1608 = vsyncadd (%p1248_p13), %s910_s16, 4294967232  ;;  %s2130_s12 = sadd.s32 4294967294, %s2127_s15  }
 0x1b1   : > { %s918_s17 = sand.u32 1, %s2130_s12  }
 0x1b2   : > { %s919_s22 = scalar_lea.sflag [#allocation18], %s918_s17 }
 0x1b3   : > { %1610 = dma.done.wait (%p1248_p13), %s919_s22, 128  }
 0x1b4   : > { %1612 = vsyncadd (%p1248_p13), %s919_s22, 4294967168  ;;  %s36_s22 = sadd.s32 1, %s2127_s15   ;;  %s2131_s24 = sld [smem:[#allocation31_spill]] }
 0x1b5   : > { %p33_p12 = scmp.ge.s32.totalorder %s36_s22, 4   ;;  %s2132_s20 = sld [smem:[#allocation27_spill]] }
 0x1b6   : > { %s2133_s21 = sld [smem:[#allocation30_spill]]  ;;  %s2134_s17 = smov %s1619_s18 }
 0x1b7   : > { %s2135_s18 = smov %s1623_s19  ;;  %35 = sbr.rel (!%p33_p12) target bundleno = 19 (0x13), region = 180 }
 0x1ba   : > { %s2136_s19 = smov %s2131_s24 }
 0x1bc   :  { %933 = vsyncpa [#allocation6], 1 }
 0x1bd   :  { %935 = vsyncpa [#allocation6 + $0x1], 1 }
 0x1be   :  { %936 = vsyncpa [#allocation9], 1 }
 0x1bf   :  { %938 = vsyncpa [#allocation9 + $0x1], 1 }
 0x1c0   :  { %939 = vsyncpa [#allocation12], 1 }
 0x1c1   :  { %940 = vsyncpa [#allocation15], 1 }
 0x1c2   :  { %941 = vsyncpa [#allocation7], 1 }
 0x1c3   :  { %943 = vsyncpa [#allocation7 + $0x1], 1 }
 0x1c4   :  { %944 = vsyncpa [#allocation18], 1 }
 0x1c5   :  { %946 = vsyncpa [#allocation18 + $0x1], 1 }

</bundles_post_ra>
